<compile_context>
chip_gen: v7x
topology: tpu7x:2x2x1
jax: 0.10.0
libtpu: 0.0.40
codegen_flags: <defaults>
</compile_context>

<pallas_src>
import jax
import jax.numpy as jnp
from jax.experimental import pallas as pl
from jax.experimental.pallas import tpu as pltpu


LANE = 128


def _round_up(n, m):
    return ((n + m - 1) // m) * m


def _self_attention_kernel(x_ref, wt_ref, wb_ref, uwc_ref, ub_ref, o_ref):
    # x_ref  : (Bt, S, Dp)  Bt batch elements, native dtype
    # wt_ref : (Dp, H)      W.weight^T (padded rows are zero), x's dtype
    # wb_ref : (1, H)       W.bias, f32
    # uwc_ref: (H, 1)       u.weight as a column, f32
    # ub_ref : (1, 1)       u.bias, f32
    bt, s, dp = x_ref.shape

    x = x_ref[...]                                   # (Bt, S, Dp), native dtype
    x2 = x.reshape(bt * s, dp)

    # hidden = tanh(x @ W^T + b): MXU matmul in the input dtype, f32 accumulate,
    # elementwise math in f32.
    h = jnp.dot(x2, wt_ref[...], preferred_element_type=jnp.float32)
    h = jnp.tanh(h + wb_ref[...])                    # (Bt*S, H) f32

    # scores = h @ u^T + u_b on the MXU (frees VPU/XLU slots).
    scores = jnp.dot(h, uwc_ref[...], preferred_element_type=jnp.float32)
    scores = scores + ub_ref[...]                    # (Bt*S, 1)
    scores = scores.reshape(bt, s, 1)

    # softmax over the seq axis, per batch row (max-subtraction for stability).
    scores = scores - jnp.max(scores, axis=1, keepdims=True)
    e = jnp.exp(scores)
    a = e * pl.reciprocal(jnp.sum(e, axis=1, keepdims=True), approx=True)

    # out = a * x  (broadcast over the feature dim), computed in f32.
    o_ref[...] = (a * x.astype(jnp.float32)).astype(o_ref.dtype)


def prepare_params(w_weight, w_bias, u_weight, u_bias, compute_dtype=jnp.float32):
    """One-time parameter preprocessing (hoisted out of the per-call hot path).

    w_weight: (H, D)  w_bias: (H,)  u_weight: (1, H)  u_bias: (1,)
    """
    H, D = w_weight.shape
    Dp = _round_up(D, LANE)
    wt = jnp.asarray(w_weight, compute_dtype).T                  # (D, H)
    if Dp != D:
        # Zero rows for padded features -> W(x_padded) == W(x), scores unchanged.
        wt = jnp.pad(wt, ((0, Dp - D), (0, 0)))
    wb = jnp.asarray(w_bias, jnp.float32).reshape(1, H)
    uwc = jnp.asarray(u_weight, jnp.float32).reshape(H, 1)       # column for MXU dot
    ub = jnp.asarray(u_bias, jnp.float32).reshape(1, 1)
    return wt, wb, uwc, ub


def _choose_block_b(B, S, Dp, H, x_itemsize, out_itemsize,
                    vmem_budget_bytes=6 << 20):
    """Largest divisor of B whose per-step working set fits a conservative VMEM
    budget (safe for v7x's smaller VMEM as well as v5e/v6e), while keeping the
    batch grid axis >= 2 steps so both v7x TensorCores can be used."""
    max_bt = B if B < 2 else B // 2
    best = 1
    for bt in range(1, max_bt + 1):
        if B % bt:
            continue
        step_bytes = (
            2 * bt * S * Dp * x_itemsize       # double-buffered input block
            + 2 * bt * S * Dp * out_itemsize   # double-buffered output block
            + 2 * bt * S * Dp * 4              # in-kernel f32 copy of x + f32 out
            + bt * S * H * 4                   # hidden activations
            + 2 * Dp * H * 4                   # weights (double-buffered)
        )
        if step_bytes <= vmem_budget_bytes:
            best = bt
    return best


def self_attention(x, wt, wb, uwc, ub):
    """x: (B, S, D) in its native dtype; wt/wb/uwc/ub from prepare_params()."""
    B, S, D = x.shape
    Dp, H = wt.shape

    if Dp != D:
        # Lane-dense padding of the feature dim (sliced off below). Trades a
        # little extra HBM traffic for unmasked, full-lane vector stores.
        x = jnp.pad(x, ((0, 0), (0, 0), (0, Dp - D)))

    bt = _choose_block_b(B, S, Dp, H, x.dtype.itemsize, x.dtype.itemsize)
    grid = (B // bt,)

    grid_spec = pltpu.PrefetchScalarGridSpec(
        num_scalar_prefetch=0,
        grid=grid,
        in_specs=[
            pl.BlockSpec((bt, S, Dp), lambda b: (b, 0, 0)),   # x, Bt batches/step
            pl.BlockSpec((Dp, H), lambda b: (0, 0)),          # W^T (full)
            pl.BlockSpec((1, H), lambda b: (0, 0)),           # W bias
            pl.BlockSpec((H, 1), lambda b: (0, 0)),           # u weight column
            pl.BlockSpec((1, 1), lambda b: (0, 0)),           # u bias
        ],
        out_specs=pl.BlockSpec((bt, S, Dp), lambda b: (b, 0, 0)),
    )

    out = pl.pallas_call(
        _self_attention_kernel,
        out_shape=jax.ShapeDtypeStruct((B, S, Dp), x.dtype),
        grid_spec=grid_spec,
        compiler_params=pltpu.CompilerParams(
            dimension_semantics=("parallel",),
        ),
    )(x, wt, wb, uwc, ub)

    if Dp != D:
        out = out[..., :D]
    return out


def self_attention_ref(x, w_weight, w_bias, u_weight, u_bias):
    """Pure-JAX reference mirroring the PyTorch forward."""
    h = jnp.tanh(jnp.einsum("bsd,hd->bsh", x, w_weight) + w_bias)      # (B,S,H)
    s = jnp.einsum("bsh,oh->bso", h, u_weight) + u_bias                # (B,S,1)
    a = jax.nn.softmax(s, axis=1)
    return a * x


if __name__ == "__main__":
    def run_case(B, S, D, H, dtype, tol):
        key = jax.random.PRNGKey(0)
        kx, kw, kwb, ku, kub = jax.random.split(key, 5)

        x = jax.random.normal(kx, (B, S, D), dtype=jnp.float32).astype(dtype)
        # Deterministic synthetic parameters (PyTorch Linear shapes).
        w_weight = jax.random.normal(kw, (H, D), dtype=jnp.float32) * 0.1   # W.weight
        w_bias = jax.random.normal(kwb, (H,), dtype=jnp.float32) * 0.1      # W.bias
        u_weight = jax.random.normal(ku, (1, H), dtype=jnp.float32) * 0.1   # u.weight
        u_bias = jax.random.normal(kub, (1,), dtype=jnp.float32) * 0.1      # u.bias

        # Parameter preprocessing hoisted out of the per-call hot path.
        params = prepare_params(w_weight, w_bias, u_weight, u_bias,
                                compute_dtype=dtype)
        fn = jax.jit(lambda xx: self_attention(xx, *params))

        out = jax.block_until_ready(fn(x))
        ref = self_attention_ref(x.astype(jnp.float32), w_weight, w_bias,
                                 u_weight, u_bias)
        assert out.shape == (B, S, D)
        assert jnp.allclose(out.astype(jnp.float32), ref, atol=tol, rtol=tol), (
            f"mismatch vs reference for shape {(B, S, D, H)} dtype={dtype}")

    # Lane-dense case: D multiple of 128, Bt-batching with a 2-step parallel grid.
    run_case(B=4, S=16, D=128, H=32, dtype=jnp.float32, tol=1e-3)
    # Small / unaligned case (original PyTorch demo sizes): exercises the
    # D -> 128 lane-padding path.
    run_case(B=2, S=8, D=32, H=16, dtype=jnp.float32, tol=1e-3)

    print("KERNEL_OK")
</pallas_src>

<mosaic_0001>
module attributes {stable_mosaic.version = 11 : i64} {
  func.func @_self_attention_kernel(%arg0: i32, %arg1: memref<2x16x128xf32, #tpu.memory_space<vmem>>, %arg2: memref<128x32xf32, #tpu.memory_space<vmem>>, %arg3: memref<1x32xf32, #tpu.memory_space<vmem>>, %arg4: memref<32x1xf32, #tpu.memory_space<vmem>>, %arg5: memref<1x1xf32, #tpu.memory_space<vmem>>, %arg6: memref<2x16x128xf32, #tpu.memory_space<vmem>>) attributes {dimension_semantics = [#tpu.dimension_semantics<parallel>], iteration_bounds = array<i64: 2>, scalar_prefetch = 0 : i64, scratch_operands = 0 : i64, tpu.core_type = #tpu.core_type<tc>, window_params = [{transform_indices = @transform_0, window_bounds = array<i64: 2, 16, 128>}, {pipeline_mode = #tpu.pipeline_mode<synchronous>, transform_indices = @transform_1, window_bounds = array<i64: 128, 32>}, {pipeline_mode = #tpu.pipeline_mode<synchronous>, transform_indices = @transform_2, window_bounds = array<i64: 1, 32>}, {pipeline_mode = #tpu.pipeline_mode<synchronous>, transform_indices = @transform_3, window_bounds = array<i64: 32, 1>}, {pipeline_mode = #tpu.pipeline_mode<synchronous>, transform_indices = @transform_4, window_bounds = array<i64: 1, 1>}, {transform_indices = @transform_5, window_bounds = array<i64: 2, 16, 128>}]} {
    %c0 = arith.constant 0 : index
    %c0_0 = arith.constant 0 : index
    %c0_1 = arith.constant 0 : index
    %0 = vector.load %arg1[%c0, %c0_0, %c0_1] : memref<2x16x128xf32, #tpu.memory_space<vmem>>, vector<2x16x128xf32>
    %1 = vector.shape_cast %0 : vector<2x16x128xf32> to vector<32x128xf32>
    %c0_2 = arith.constant 0 : index
    %c0_3 = arith.constant 0 : index
    %2 = vector.load %arg2[%c0_2, %c0_3] : memref<128x32xf32, #tpu.memory_space<vmem>>, vector<128x32xf32>
    %cst = arith.constant dense<0.000000e+00> : vector<32x32xf32>
    %3 = tpu.matmul %1, %2, %cst {dimension_numbers = #tpu.dot_dimension_numbers<[1], [0], [0], [1], [0, 0, 1, 1], [], []>} : vector<32x128xf32>, vector<128x32xf32>, vector<32x32xf32> -> vector<32x32xf32>
    %c0_4 = arith.constant 0 : index
    %c0_5 = arith.constant 0 : index
    %4 = vector.load %arg3[%c0_4, %c0_5] : memref<1x32xf32, #tpu.memory_space<vmem>>, vector<1x32xf32>
    %5 = vector.broadcast %4 : vector<1x32xf32> to vector<32x32xf32>
    %6 = arith.addf %3, %5 : vector<32x32xf32>
    %7 = math.tanh %6 : vector<32x32xf32>
    %c0_6 = arith.constant 0 : index
    %c0_7 = arith.constant 0 : index
    %8 = vector.load %arg4[%c0_6, %c0_7] : memref<32x1xf32, #tpu.memory_space<vmem>>, vector<32x1xf32>
    %cst_8 = arith.constant dense<0.000000e+00> : vector<32x1xf32>
    %9 = tpu.matmul %7, %8, %cst_8 {dimension_numbers = #tpu.dot_dimension_numbers<[1], [0], [0], [1], [0, 0, 1, 1], [], []>} : vector<32x32xf32>, vector<32x1xf32>, vector<32x1xf32> -> vector<32x1xf32>
    %c0_9 = arith.constant 0 : index
    %c0_10 = arith.constant 0 : index
    %10 = vector.load %arg5[%c0_9, %c0_10] : memref<1x1xf32, #tpu.memory_space<vmem>>, vector<1x1xf32>
    %11 = vector.broadcast %10 : vector<1x1xf32> to vector<32x1xf32>
    %12 = arith.addf %9, %11 : vector<32x1xf32>
    %13 = vector.shape_cast %12 : vector<32x1xf32> to vector<2x16x1xf32>
    %cst_11 = arith.constant dense<0xFF800000> : vector<2x1xf32>
    %14 = vector.multi_reduction <maximumf>, %13, %cst_11 [1] : vector<2x16x1xf32> to vector<2x1xf32>
    %15 = vector.shape_cast %14 : vector<2x1xf32> to vector<2x1x1xf32>
    %16 = vector.broadcast %15 : vector<2x1x1xf32> to vector<2x16x1xf32>
    %17 = arith.subf %13, %16 : vector<2x16x1xf32>
    %18 = math.exp %17 : vector<2x16x1xf32>
    %cst_12 = arith.constant dense<0.000000e+00> : vector<2x1xf32>
    %19 = vector.multi_reduction <add>, %18, %cst_12 [1] : vector<2x16x1xf32> to vector<2x1xf32>
    %20 = vector.shape_cast %19 : vector<2x1xf32> to vector<2x1x1xf32>
    %21 = tpu.reciprocal %20 {approx = true} : vector<2x1x1xf32> -> vector<2x1x1xf32>
    %22 = vector.broadcast %21 : vector<2x1x1xf32> to vector<2x16x1xf32>
    %23 = arith.mulf %18, %22 : vector<2x16x1xf32>
    %24 = vector.broadcast %23 : vector<2x16x1xf32> to vector<2x16x128xf32>
    %25 = arith.mulf %24, %0 : vector<2x16x128xf32>
    %c0_13 = arith.constant 0 : index
    %c0_14 = arith.constant 0 : index
    %c0_15 = arith.constant 0 : index
    %26 = vector.load %arg6[%c0_13, %c0_14, %c0_15] : memref<2x16x128xf32, #tpu.memory_space<vmem>>, vector<2x16x128xf32>
    tpu.vector_store %arg6[%c0_13, %c0_14, %c0_15], %25 {strides = array<i32>} : memref<2x16x128xf32, #tpu.memory_space<vmem>>, vector<2x16x128xf32>,
    return
  }
  func.func @transform_0(%arg0: i32) -> (i32, i32, i32) {
    %c0_i32 = arith.constant 0 : i32
    %c0_i32_0 = arith.constant 0 : i32
    %c0_i32_1 = arith.constant 0 : i32
    return %arg0, %c0_i32, %c0_i32_0 : i32, i32, i32
  }
  func.func @transform_1(%arg0: i32) -> (i32, i32) {
    %c0_i32 = arith.constant 0 : i32
    %c0_i32_0 = arith.constant 0 : i32
    %c0_i32_1 = arith.constant 0 : i32
    return %c0_i32, %c0_i32_0 : i32, i32
  }
  func.func @transform_2(%arg0: i32) -> (i32, i32) {
    %c0_i32 = arith.constant 0 : i32
    %c0_i32_0 = arith.constant 0 : i32
    %c0_i32_1 = arith.constant 0 : i32
    return %c0_i32, %c0_i32_0 : i32, i32
  }
  func.func @transform_3(%arg0: i32) -> (i32, i32) {
    %c0_i32 = arith.constant 0 : i32
    %c0_i32_0 = arith.constant 0 : i32
    %c0_i32_1 = arith.constant 0 : i32
    return %c0_i32, %c0_i32_0 : i32, i32
  }
  func.func @transform_4(%arg0: i32) -> (i32, i32) {
    %c0_i32 = arith.constant 0 : i32
    %c0_i32_0 = arith.constant 0 : i32
    %c0_i32_1 = arith.constant 0 : i32
    return %c0_i32, %c0_i32_0 : i32, i32
  }
  func.func @transform_5(%arg0: i32) -> (i32, i32, i32) {
    %c0_i32 = arith.constant 0 : i32
    %c0_i32_0 = arith.constant 0 : i32
    %c0_i32_1 = arith.constant 0 : i32
    return %arg0, %c0_i32, %c0_i32_0 : i32, i32, i32
  }
}

</mosaic_0001>

<bundles_post_ra>
// kernel: _lambda_.1
= control target key start
LH: loop header
LB: loop body
LE: loop exit
PB: predicated region body
PF: predicated region fallthrough
CT: control target
= control target key end

     0   :  { %s1416_s0 = inlined_call_operand.hbm [shape: f32[4,16,128], index: 0, kind: input, shape index: {}]   ;;  %s1417_s1 = inlined_call_operand.hbm [shape: f32[128,32], index: 1, kind: input, shape index: {}]   ;;  %s1418_s2 = inlined_call_operand.vmem [shape: f32[1,32], index: 2, kind: input, shape index: {}]   ;;  %s1419_s3 = inlined_call_operand.hbm [shape: f32[32,1], index: 3, kind: input, shape index: {}]   ;;  %s1420_s4 = inlined_call_operand.<no memory space> [shape: f32[1,1], index: 4, kind: input, shape index: {}]   ;;  %s1421_s5 = inlined_call_operand.hbm [shape: f32[4,16,128], index: 5, kind: output, shape index: {}]  }
   0x1   :  { %v10_v0 = vstv %s1420_s4 }
   0x2   :  { %11 = vst [vmem:[#allocation2] sm:$0x1] %v10_v0 }
   0x3   :  { %12 = vsyncpa [#allocation4], 0 }
   0x4   :  { %14 = vsyncpa [#allocation4 + $0x1], 0 }
   0x5   :  { %15 = vsyncpa [#allocation7], 0 }
   0x6   :  { %16 = vsyncpa [#allocation5], 0 }
   0x7   :  { %18 = vsyncpa [#allocation5 + $0x1], 0  ;;  %s1136_s20 = smov 0   ;;  %s1138_s21 = smov 0  }
   0x8   :  { %s1140_s22 = smov 0   ;;  %s1142_s23 = smov 0  }
   0x9 LB: > { %s1157_s4 = sadd.s32 4294967295, %s1092_s23   ;;  %s692_s24 = sadd.s32 4294967294, %s1092_s23   ;;  %s1092_s23 = sphi %s1142_s23, %s1441_s23   ;;  %s1088_s22 = sphi %s1140_s22, %s1440_s22   ;;  %s1084_s21 = sphi %s1138_s21, %s1439_s21   ;;  %s1080_s20 = sphi %s1136_s20, %s1438_s20  }
   0xa   : > { %p44_p0 = scmp.ne.s32.totalorder %s1084_s21, %s1080_s20  ;;  %p1422_p1 = scmp.eq.s32.totalorder %s1157_s4, 0 }
   0xb   : > { %p158_p3 = scmp.eq.s32.totalorder %s692_s24, 1  ;;  %p693_p5 = scmp.ge.s32.totalorder %s1092_s23, 1 }
   0xc   : > { %p1166_p4 = por %p1422_p1, %p44_p0  ;;  %p165_p7 = scmp.lt.s32.totalorder %s1092_s23, 3 }
   0xd   : > { %p1171_p6 = por %p158_p3, %p44_p0  ;;  %s1094_s28 = smov [#allocation6]  }
   0xe   : > { %s1425_s25 = scalar_select %p1166_p4, 1, 0 }
   0xf   : > { %s1426_s26 = scalar_select %p1171_p6, 1, 0 }
  0x10   : > { %p1176_p8 = pnand %p693_p5, %p165_p7  ;;  %s177_s29 = sshll.u32 %s1094_s28, 4  ;;  %s1180_s29 = int_to_ptr.vmem [resolvable:$true] %s177_s29 }
  0x11   : > { %s1095_s6 = smov [#allocation8]   ;;  %s936_s10 = scalar_lea.hbm %s1417_s1, 2048 }
  0x12   : > { %p854_p9 = pneg %p1176_p8  ;;  %s193_s7 = sshll.u32 %s1095_s6, 4  ;;  %s1191_s7 = int_to_ptr.vmem [resolvable:$true] %s193_s7 }
  0x13   : > { %p937_p12 = scmp.ne.s32.totalorder %s1417_s1, %s936_s10  ;;  %p943_p5 = scmp.lt.u32.totalorder %s936_s10, %s1417_s1 }
  0x14   : > { %p1187_p11 = pnand %p854_p9, %p1422_p1 }
  0x16   : > { %p938_p13 = pneg %p1187_p11 }
  0x18   : > { %p939_p0 = pnand %p938_p13, %p937_p12 }
  0x1a   : > { %p940_p3 = pneg %p939_p0 }
  0x1c   : > { %p945_p7 = pnand %p943_p5, %p940_p3 }
  0x1e   : > { %948 = shalt.err (!%p945_p7)
}
  0x1f   : > { %s949_s15 = scalar_lea.vmem %s1180_s29, 2048  ;;  %p957_p2 = scmp.lt.s32.totalorder %s1180_s29, %s1180_s29 }
  0x20   : > { %p950_p9 = scmp.ne.s32.totalorder %s1180_s29, %s949_s15  ;;  %p958_p12 = scmp.lt.s32.totalorder %s949_s15, %s949_s15 }
  0x22   : > { %p952_p10 = pnand %p950_p9, %p938_p13  ;;  %p959_p0 = por %p958_p12, %p957_p2 }
  0x24   : > { %p953_p1 = pneg %p952_p10 }
  0x26   : > { %p960_p6 = pnand %p959_p0, %p953_p1 }
  0x28   : > { %963 = shalt.err (!%p960_p6)
}
  0x29   : > { %s1096_s16 = smov 128   ;;  %s1097_s17 = smov 8  }
  0x2a   : > { %857 = dma.hbm_to_vmem [thread:$0]  (!%p1187_p11), %s1417_s1, 2048, %s1180_s29, [#allocation7], %s1096_s16, %s1096_s16, %s1097_s17  }
  0x2b   : > { %s964_s6 = scalar_lea.hbm %s1419_s3, 512 }
  0x2c   : > { %p965_p1 = scmp.ne.s32.totalorder %s1419_s3, %s964_s6  ;;  %p971_p10 = scmp.lt.u32.totalorder %s964_s6, %s1419_s3 }
  0x2e   : > { %p967_p2 = pnand %p965_p1, %p938_p13 }
  0x30   : > { %p968_p6 = pneg %p967_p2 }
  0x32   : > { %p973_p3 = pnand %p971_p10, %p968_p6 }
  0x34   : > { %976 = shalt.err (!%p973_p3)
}
  0x35   : > { %s977_s29 = scalar_lea.vmem %s1191_s7, 512  ;;  %p985_p12 = scmp.lt.s32.totalorder %s1191_s7, %s1191_s7 }
  0x36   : > { %p978_p5 = scmp.ne.s32.totalorder %s1191_s7, %s977_s29  ;;  %p986_p0 = scmp.lt.s32.totalorder %s977_s29, %s977_s29 }
  0x38   : > { %p980_p7 = pnand %p978_p5, %p938_p13  ;;  %p987_p1 = por %p986_p0, %p985_p12 }
  0x3a   : > { %p981_p9 = pneg %p980_p7 }
  0x3c   : > { %p988_p2 = pnand %p987_p1, %p981_p9 }
  0x3e   : > { %991 = shalt.err (!%p988_p2)
}
  0x3f   : > { %860 = dma.hbm_to_vmem [thread:$0]  (!%p1187_p11), %s1419_s3, 512, %s1191_s7, [#allocation7], %s1096_s16, %s1096_s16, %s1097_s17  }
  0x40   : > { %s1252_s30 = sadd.s32 1, %s1092_s23   ;;  %s31_s14 = sadd.s32 1, %s1088_s22 }
  0x41   : > { %s28_s15 = ssub.s32 %s1092_s23, %s1252_s30  ;;  %p38_p13 = scmp.ne.s32.totalorder %s1088_s22, %s1084_s21 }
  0x42   : > { %p29_p6 = scmp.eq.s32.totalorder %s28_s15, 0  ;;  %p39_p10 = scmp.eq.s32.totalorder %s1092_s23, 0 }
  0x43   : > { %p1429_p3 = scmp.eq.s32.totalorder %s1157_s4, 1  ;;  %p871_p7 = scmp.lt.s32.totalorder %s1092_s23, 2 }
  0x44   : > { %s1268_s19 = scalar_select %p29_p6, %s1088_s22, %s31_s14  }
  0x45   : > { %p1262_p5 = por %p1429_p3, %p38_p13  ;;  %p40_p9 = por %p39_p10, %p38_p13 }
  0x46   : > { %s210_s24 = sand.u32 1, %s1088_s22   ;;  %s719_s7 = sshll.u32 %s1092_s23, 9 }
  0x47   : > { %s1430_s18 = scalar_select %p1262_p5, 1, 0 }
  0x48   : > { %s697_s28 = sshll.u32 %s210_s24, 5  ;;  %s1275_s9 = scalar_lea.hbm %s1416_s0, %s719_s7 }
  0x49   : > { %s214_s10 = scalar_lea.vmem [#allocation3], %s697_s28  ;;  %p1279_p11 = pnand %p871_p7, %p40_p9 }
  0x4a   : > { %s222_s11 = sshll.u32 %s214_s10, 4  ;;  %s1283_s12 = scalar_lea.sflag [#allocation4], %s210_s24  ;;  %s1277_s11 = int_to_ptr.vmem [resolvable:$true] %s222_s11 }
  0x4b   : > { %s992_s13 = scalar_lea.hbm %s1275_s9, 512  ;;  %p994_p0 = pneg %p1279_p11 }
  0x4c   : > { %p993_p12 = scmp.ne.s32.totalorder %s1275_s9, %s992_s13  ;;  %s997_s28 = scalar_lea.hbm %s1416_s0, 1024 }
  0x4d   : > { %p998_p13 = scmp.lt.u32.totalorder %s1275_s9, %s1416_s0  ;;  %p999_p6 = scmp.lt.u32.totalorder %s997_s28, %s992_s13 }
  0x4e   : > { %p995_p1 = pnand %p994_p0, %p993_p12  ;;  %p1001_p3 = scmp.lt.u32.totalorder %s992_s13, %s1275_s9 }
  0x4f   : > { %p1000_p10 = por %p999_p6, %p998_p13 }
  0x50   : > { %p996_p2 = pneg %p995_p1 }
  0x51   : > { %p1002_p7 = por %p1001_p3, %p1000_p10 }
  0x53   : > { %p1003_p9 = pnand %p1002_p7, %p996_p2 }
  0x55   : > { %1006 = shalt.err (!%p1003_p9)
}
  0x56   : > { %s1007_s24 = scalar_lea.vmem %s1277_s11, 512  ;;  %s1098_s8 = smov [#allocation3]  }
  0x57   : > { %p1008_p12 = scmp.ne.s32.totalorder %s1277_s11, %s1007_s24  ;;  %s1012_s10 = sshll.u32 %s1098_s8, 4  ;;  %s1013_s10 = int_to_ptr.vmem [resolvable:$false] %s1012_s10 }
  0x58   : > { %s1014_s14 = scalar_lea.vmem %s1013_s10, 1024  ;;  %p1015_p4 = scmp.lt.s32.totalorder %s1277_s11, %s1013_s10 }
  0x59   : > { %p1010_p1 = pnand %p1008_p12, %p994_p0  ;;  %p1016_p13 = scmp.lt.s32.totalorder %s1014_s14, %s1007_s24 }
  0x5b   : > { %p1011_p5 = pneg %p1010_p1  ;;  %p1017_p6 = por %p1016_p13, %p1015_p4 }
  0x5d   : > { %p1018_p10 = pnand %p1017_p6, %p1011_p5 }
  0x5f   : > { %1021 = shalt.err (!%p1018_p10)
}
  0x60   : > { %864 = dma.hbm_to_vmem [thread:$0]  (!%p1279_p11), %s1275_s9, 512, %s1277_s11, %s1283_s12, %s1096_s16, %s1096_s16, %s1097_s17  }
  0x61   : > { %234 = sbr.rel (%p1176_p8) target bundleno = 797 (0x31d), region = 40  ;;  %s1317_s13 = sand.u32 (!%p1176_p8), 1, %s1084_s21  }
  0x62   : > { %s702_s15 = sshll.u32 (!%p1176_p8), %s1317_s13, 5  ;;  %s237_s28 = scalar_lea.sflag (!%p1176_p8), [#allocation4], %s1317_s13 }
  0x63   : > { %s1323_s29 = scalar_lea.vmem (!%p1176_p8), [#allocation3], %s702_s15  ;;  %p1432_p4 = scmp.ne.s32.totalorder (!%p1176_p8), %s1425_s25, 0 }
  0x68   : > { %1067 = dma.done.wait (%p1432_p4), %s237_s28, 512  }
  0x69   : > { %1069 = vsyncadd (%p1432_p4), %s237_s28, 4294966784  ;;  %p1433_p5 = scmp.eq.s32.totalorder %s1157_s4, 0 }
  0x6b   : > { %1071 = dma.done.wait (%p1433_p5), [#allocation7], 2560   ;;  %p1434_p8 = pmov %p1433_p5 }
  0x6c   : > { %v281_v1 = vld [vmem:[#allocation6] sm:$0xff]  ;;  %v282_v2 = vld [vmem:[#allocation6 + $0x8] sm:$0xff]  ;;  %v283_v3 = vld [vmem:[#allocation6 + $0x10] sm:$0xff]  ;;  %vm404_vm0 = vcmask 261120   ;;  %v1099_v48 = vmov 0   ;;  %vm502_vm1 = vcmask 7168  }
  0x6d   : > { %1073 = vsyncadd (%p1434_p8), [#allocation7], 4294964736  ;;  %v802_v4 = vpack.c.bf16 %v282_v2, %v281_v1  ;;  %v284_v5 = vld [vmem:[#allocation6 + $0x18] sm:$0xff]  ;;  %v285_v7 = vld [vmem:[#allocation6 + $0x20] sm:$0xff]  ;;  %914 = vset.pattern.permute.xlu0 %v1099_v48  ;;  %915 = vset.pattern.permute.xlu1 %v1099_v48  ;;  %s274_s16 = scalar_lea.vmem [#allocation9], %s702_s15  ;;  %s721_s9 = sshll.u32 %s1157_s4, 9 }
  0x6e   : > { %v806_v6 = vpack.c.bf16 %v284_v5, %v283_v3  ;;  %v286_v8 = vld [vmem:[#allocation6 + $0x28] sm:$0xff]  ;;  %v1334_v10 = vld [vmem:[%s1323_s29] sm:$0xff]  ;;  %v287_v11 = vld [vmem:[#allocation6 + $0x30] sm:$0xff]  ;;  %s600_s17 = sshll.u32 %s274_s16, 4  ;;  %s1371_s7 = scalar_lea.hbm %s1421_s5, %s721_s9  ;;  %s1366_s17 = int_to_ptr.vmem [resolvable:$true] %s600_s17 }
  0x6f   : > { %803 = vmatprep.subr.bf16.mxu0 %v802_v4  ;;  %v810_v9 = vpack.c.bf16 %v286_v8, %v285_v7  ;;  %v288_v12 = vld [vmem:[#allocation6 + $0x38] sm:$0xff]  ;;  %782 = vmatprep.mubr.f32.mxu0 %v1334_v10  ;;  %v289_v14 = vld [vmem:[#allocation6 + $0x40] sm:$0xff]  ;;  %v290_v15 = vld [vmem:[#allocation6 + $0x48] sm:$0xff]  ;;  %s586_s6 = scalar_lea.sflag [#allocation5], %s1317_s13  ;;  %s1022_s24 = scalar_lea.vmem %s1366_s17, 512 }
  0x70   : > { %805 = vmatpush3.bf16.msra.mxu0 %v802_v4  ;;  %v814_v13 = vpack.c.bf16 %v288_v12, %v287_v11  ;;  %v818_v16 = vpack.c.bf16 %v290_v15, %v289_v14  ;;  %v291_v17 = vld [vmem:[#allocation6 + $0x50] sm:$0xff]  ;;  %v292_v18 = vld [vmem:[#allocation6 + $0x58] sm:$0xff]  ;;  %v293_v20 = vld [vmem:[#allocation6 + $0x60] sm:$0xff]  ;;  %p1023_p11 = scmp.ne.s32.totalorder %s1366_s17, %s1022_s24  ;;  %p1435_p0 = scmp.ne.s32.totalorder %s1430_s18, 0 }
  0x71   : > { %807 = vmatprep.subr.bf16.mxu0 %v806_v6  ;;  %v822_v19 = vpack.c.bf16 %v292_v18, %v291_v17  ;;  %v294_v21 = vld [vmem:[#allocation6 + $0x68] sm:$0xff]  ;;  %v295_v23 = vld [vmem:[#allocation6 + $0x70] sm:$0xff]  ;;  %v296_v24 = vld [vmem:[#allocation6 + $0x78] sm:$0xff]  ;;  %s1100_s4 = smov [#allocation9]  }
  0x72   : > { %v826_v22 = vpack.c.bf16 %v294_v21, %v293_v20  ;;  %v830_v25 = vpack.c.bf16 %v296_v24, %v295_v23  ;;  %v1338_v26 = vld [vmem:[%s1323_s29 + $0x8] sm:$0xff]  ;;  %v1341_v27 = vld [vmem:[%s1323_s29 + $0x10] sm:$0xff]  ;;  %v1346_v28 = vld [vmem:[%s1323_s29 + $0x18] sm:$0xff]  ;;  %p1024_p2 = pnand %p1023_p11, %p1435_p0  ;;  %s1026_s8 = sshll.u32 %s1100_s4, 4  ;;  %s1027_s8 = int_to_ptr.vmem [resolvable:$false] %s1026_s8 }
  0x73   : > { %v393_v29 = vld [vmem:[#allocation8] sm:$0xff]  ;;  %v394_v30 = vld [vmem:[#allocation8 + $0x8] sm:$0xff]  ;;  %v395_v32 = vld [vmem:[#allocation8 + $0x10] sm:$0xff]  ;;  %s1028_s10 = scalar_lea.vmem %s1027_s8, 1024  ;;  %p1029_p7 = scmp.lt.s32.totalorder %s1366_s17, %s1027_s8 }
  0x74   : > { %809 = vmatpush3.bf16.msra.mxu0 %v806_v6  ;;  %v834_v31 = vpack.c.bf16 %v394_v30, %v393_v29  ;;  %v396_v33 = vld [vmem:[#allocation8 + $0x18] sm:$0xff]  ;;  %p1025_p3 = pneg %p1024_p2  ;;  %p1030_p9 = scmp.lt.s32.totalorder %s1028_s10, %s1022_s24 }
  0x75   : > { %811 = vmatprep.subr.bf16.mxu0 %v810_v9  ;;  %v838_v34 = vpack.c.bf16 %v396_v33, %v395_v32  ;;  %v706_v35 = vld [vmem:[%s1418_s2] ss:$0 sm:$0xff] }
  0x76   : > { %835 = vmatprep.subr.bf16.mxu1 %v834_v31  ;;  %v707_v49 = vld [vmem:[#allocation2] ss:$0 sm:$0xff]  ;;  %p1031_p12 = por %p1030_p9, %p1029_p7 }
  0x77   : > { %837 = vmatpush3.bf16.msra.mxu1 %v834_v31 }
  0x78   : > { %813 = vmatpush3.bf16.msra.mxu0 %v810_v9  ;;  %839 = vmatprep.subr.bf16.mxu1 %v838_v34  ;;  %p1032_p1 = pnand %p1031_p12, %p1025_p3 }
  0x79   : > { %815 = vmatprep.subr.bf16.mxu0 %v814_v13 }
  0x7b   : > { %841 = vmatpush3.bf16.msra.mxu1 %v838_v34 }
  0x7c   : > { %817 = vmatpush3.bf16.msra.mxu0 %v814_v13 }
  0x7d   : > { %819 = vmatprep.subr.bf16.mxu0 %v818_v16 }
  0x80   : > { %821 = vmatpush3.bf16.msra.mxu0 %v818_v16 }
  0x81   : > { %823 = vmatprep.subr.bf16.mxu0 %v822_v19 }
  0x84   : > { %825 = vmatpush3.bf16.msra.mxu0 %v822_v19 }
  0x85   : > { %827 = vmatprep.subr.bf16.mxu0 %v826_v22 }
  0x88   : > { %829 = vmatpush3.bf16.msra.mxu0 %v826_v22 }
  0x89   : > { %831 = vmatprep.subr.bf16.mxu0 %v830_v25 }
  0x8c   : > { %833 = vmatpush3.bf16.msra.mxu0 %v830_v25 }
  0x8f   : > { %783 = vmatmul.mubr.f32.vlgmr.msra.gmra.mrb[0].mxu0 %v1338_v26 }
  0x90   : > { %785 = vmatprep.mubr.f32.mxu0 %v1341_v27 }
  0x93   : > { %786 = vmatmul.mubr.f32.gmra.mrb[2].mxu0 %v1346_v28 }
 0x162   : > { %v784_v36 = vpop.f32.mrb[0].mxu0 }
 0x163   : > { %v376_v37 = vadd.f32 %v784_v36, %v706_v35  ;;  %v370_v38 = vpop.f32.mrb[1].mxu0 }
 0x164   : > { %v371_v39 = vadd.f32 %v706_v35, %v370_v38 }
 0x166   : > { %916 = vtanh.f32 %v371_v39  ;;  %v787_v40 = vpop.f32.mrb[2].mxu0 }
 0x167   : > { %918 = vtanh.f32 %v376_v37  ;;  %v386_v41 = vadd.f32 %v787_v40, %v706_v35  ;;  %v380_v42 = vpop.f32.mrb[3].mxu0 }
 0x168   : > { %v381_v43 = vadd.f32 %v706_v35, %v380_v42 }
 0x16a   : > { %920 = vtanh.f32 %v381_v43 }
 0x16b   : > { %922 = vtanh.f32 %v386_v41 }
 0x170   : > { %v917_v44 = vpop.eup %916 }
 0x171   : > { %v919_v45 = vpop.eup %918  ;;  %796 = vmatprep.mubr.msk.f32.mxu1 %vm404_vm0, %v917_v44 }
 0x172   : > { %797 = vmatmul.mubr.msk.f32.vlgmr.msra.gmra.mrb[0].mxu1 %vm404_vm0, %v919_v45 }
 0x174   : > { %v921_v46 = vpop.eup %920 }
 0x175   : > { %v923_v47 = vpop.eup %922  ;;  %799 = vmatprep.mubr.msk.f32.mxu1 %vm404_vm0, %v921_v46 }
 0x176   : > { %800 = vmatmul.mubr.msk.f32.gmra.mrb[2].mxu1 %vm404_vm0, %v923_v47 }
 0x245   : > { %v798_v50 = vpop.f32.mrb[0].mxu1 }
 0x246   : > { %v489_v51 = vadd.f32 %v798_v50, %v707_v49  ;;  %v483_v52 = vpop.f32.mrb[1].mxu1 }
 0x247   : > { %v484_v53 = vadd.f32 %v707_v49, %v483_v52 }
 0x248   : > { %v504_v54 = vsel %vm502_vm1, %v489_v51, -inf }
 0x249   : > { %v503_v55 = vsel %vm502_vm1, %v484_v53, -inf  ;;  %v801_v56 = vpop.f32.mrb[2].mxu1 }
 0x24a   : > { %v505_v57 = vmax.f32 %v503_v55, %v504_v54  ;;  %v499_v58 = vadd.f32 %v801_v56, %v707_v49  ;;  %v493_v59 = vpop.f32.mrb[3].mxu1 }
 0x24b   : > { %v494_v60 = vadd.f32 %v707_v49, %v493_v59 }
 0x24c   : > { %v506_v61 = vrot.slane %v505_v57, 4  ;;  %v513_v62 = vsel %vm502_vm1, %v499_v58, -inf }
 0x24d   : > { %v512_v63 = vsel %vm502_vm1, %v494_v60, -inf }
 0x24e   : > { %v507_v0 = vmax.f32 %v505_v57, %v506_v61  ;;  %v514_v1 = vmax.f32 %v512_v63, %v513_v62 }
 0x250   : > { %v508_v2 = vrot.slane %v507_v0, 2  ;;  %v515_v3 = vrot.slane %v514_v1, 4 }
 0x252   : > { %v509_v4 = vmax.f32 %v507_v0, %v508_v2  ;;  %v516_v5 = vmax.f32 %v514_v1, %v515_v3 }
 0x254   : > { %v510_v6 = vrot.slane %v509_v4, 1  ;;  %v517_v7 = vrot.slane %v516_v5, 2 }
 0x256   : > { %v511_v8 = vmax.f32 %v509_v4, %v510_v6  ;;  %v518_v9 = vmax.f32 %v516_v5, %v517_v7 }
 0x258   : > { %v521_v11 = vsub.f32 %v484_v53, %v511_v8  ;;  %v522_v12 = vsub.f32 %v489_v51, %v511_v8  ;;  %v519_v13 = vrot.slane %v518_v9, 1 }
 0x25a   : > { %v525_v14 = vmul.f32 1.442695, %v521_v11  ;;  %v527_v15 = vmul.f32 1.442695, %v522_v12  ;;  %v520_v16 = vmax.f32 %v518_v9, %v519_v13 }
 0x25c   : > { %924 = vpow2.f32 %v525_v14  ;;  %v523_v17 = vsub.f32 %v494_v60, %v520_v16  ;;  %v524_v18 = vsub.f32 %v499_v58, %v520_v16 }
 0x25d   : > { %926 = vpow2.f32 %v527_v15 }
 0x25e   : > { %v529_v19 = vmul.f32 1.442695, %v523_v17  ;;  %v531_v20 = vmul.f32 1.442695, %v524_v18 }
 0x260   : > { %928 = vpow2.f32 %v529_v19 }
 0x261   : > { %930 = vpow2.f32 %v531_v20 }
 0x266   : > { %v925_v21 = vpop.eup %924 }
 0x267   : > { %v927_v22 = vpop.eup %926  ;;  %v533_v23 = vsel %vm502_vm1, %v925_v21, 0.0 }
 0x268   : > { %v534_v24 = vsel %vm502_vm1, %v927_v22, 0.0 }
 0x269   : > { %v535_v25 = vadd.f32 %v534_v24, %v533_v23 }
 0x26a   : > { %v929_v29 = vpop.eup %928 }
 0x26b   : > { %v931_v30 = vpop.eup %930  ;;  %v536_v31 = vrot.slane %v535_v25, 4  ;;  %v542_v32 = vsel %vm502_vm1, %v929_v29, 0.0 }
 0x26c   : > { %v543_v33 = vsel %vm502_vm1, %v931_v30, 0.0 }
 0x26d   : > { %v544_v34 = vadd.f32 %v543_v33, %v542_v32  ;;  %v537_v35 = vadd.f32 %v536_v31, %v535_v25 }
 0x26f   : > { %v545_v36 = vrot.slane %v544_v34, 4  ;;  %v538_v37 = vrot.slane %v537_v35, 2 }
 0x271   : > { %v539_v38 = vadd.f32 %v538_v37, %v537_v35  ;;  %v546_v39 = vadd.f32 %v545_v36, %v544_v34 }
 0x273   : > { %v540_v40 = vrot.slane %v539_v38, 1  ;;  %v547_v41 = vrot.slane %v546_v39, 2 }
 0x275   : > { %v541_v42 = vadd.f32 %v540_v40, %v539_v38  ;;  %v548_v43 = vadd.f32 %v547_v41, %v546_v39 }
 0x277   : > { %932 = vrcp.f32 %v541_v42  ;;  %v549_v44 = vrot.slane %v548_v43, 1 }
 0x279   : > { %v550_v45 = vadd.f32 %v549_v44, %v548_v43 }
 0x27b   : > { %934 = vrcp.f32 %v550_v45 }
 0x281   : > { %v933_v46 = vpop.eup %932 }
 0x282   : > { %v553_v47 = vmul.f32 %v933_v46, %v925_v21  ;;  %v554_v48 = vmul.f32 %v933_v46, %v927_v22 }
 0x284   : > { %559 = vperm.xlu0 %914, %v553_v47  }
 0x285   : > { %v935_v49 = vpop.eup %934 }
 0x286   : > { %v555_v50 = vmul.f32 %v935_v49, %v929_v29  ;;  %v556_v51 = vmul.f32 %v935_v49, %v931_v30 }
 0x288   : > { %569 = vperm.xlu1 %915, %v555_v50   ;;  %564 = vperm.xlu0 %914, %v554_v48  }
 0x28c   : > { %574 = vperm.xlu1 %915, %v556_v51  }
 0x303   : > { %v560_v52 = vpop.permute.xlu0 %559 }
 0x304   : > { %v577_v53 = vmul.f32 %v560_v52, %v1334_v10 }
 0x306   : > { %581 = vst [vmem:[%s274_s16] sm:$0xff] %v577_v53 }
 0x307   : > { %v570_v54 = vpop.permute.xlu1 %569  ;;  %v565_v55 = vpop.permute.xlu0 %564 }
 0x308   : > { %v579_v56 = vmul.f32 %v570_v54, %v1341_v27  ;;  %v578_v57 = vmul.f32 %v565_v55, %v1338_v26 }
 0x30a   : > { %583 = vst [vmem:[%s274_s16 + $0x10] sm:$0xff] %v579_v56  ;;  %582 = vst [vmem:[%s274_s16 + $0x8] sm:$0xff] %v578_v57 }
 0x30b   : > { %v575_v10 = vpop.permute.xlu1 %574 }
 0x30c   : > { %v580_v58 = vmul.f32 %v575_v10, %v1346_v28 }
 0x30e   : > { %584 = vst [vmem:[%s274_s16 + $0x18] sm:$0xff] %v580_v58 }
 0x30f   : > { %1035 = shalt.err (!%p1032_p1)
}
 0x310   : > { %s1036_s14 = scalar_lea.hbm %s1371_s7, 512  ;;  %s1040_s29 = scalar_lea.hbm %s1421_s5, 1024 }
 0x311   : > { %p1037_p13 = scmp.ne.s32.totalorder %s1371_s7, %s1036_s14  ;;  %p1041_p4 = scmp.lt.u32.totalorder %s1371_s7, %s1421_s5 }
 0x312   : > { %p1042_p5 = scmp.lt.u32.totalorder %s1040_s29, %s1036_s14  ;;  %p1044_p11 = scmp.lt.u32.totalorder %s1036_s14, %s1371_s7 }
 0x313   : > { %p1038_p6 = pnand %p1037_p13, %p1435_p0 }
 0x314   : > { %p1043_p8 = por %p1042_p5, %p1041_p4 }
 0x315   : > { %p1039_p10 = pneg %p1038_p6 }
 0x316   : > { %p1045_p2 = por %p1044_p11, %p1043_p8 }
 0x318   : > { %p1046_p3 = pnand %p1045_p2, %p1039_p10 }
 0x31a   : > { %1049 = shalt.err (!%p1046_p3)
}
 0x31b   : > { %s1101_s16 = smov 128   ;;  %s1102_s9 = smov 8  }
 0x31c   : > { %852 = dma.vmem_to_hbm [thread:$0]  (%p1435_p0), %s1366_s17, 512, %s1371_s7, %s586_s6, %s1101_s16, %s1101_s16, %s1102_s9  }
 0x31d PF: > { %s615_s11 = sand.u32 1, %s1080_s20   ;;  %p1436_p7 = scmp.ne.s32.totalorder %s1426_s26, 0 }
 0x31e   : > { %p1437_p9 = scmp.ge.s32.totalorder %s1092_s23, 2  ;;  %s616_s12 = scalar_lea.sflag [#allocation5], %s615_s11 }
 0x320   : > { %p866_p12 = pnand %p1437_p9, %p1436_p7 }
 0x322   : > { %1075 = dma.done.wait (!%p866_p12), %s616_s12, 512  }
 0x323   : > { %1077 = vsyncadd (!%p866_p12), %s616_s12, 4294966784  ;;  %p21_p1 = scmp.ge.s32.totalorder %s1252_s30, 4   ;;  %s1438_s20 = smov %s1084_s21 }
 0x324   : > { %s1439_s21 = smov %s1088_s22  ;;  %s1440_s22 = smov %s1268_s19 }
 0x325   : > { %s1441_s23 = smov %s1252_s30  ;;  %23 = sbr.rel (!%p21_p1) target bundleno = 9 (0x9), region = 93 }
 0x32c   :  { %621 = vsyncpa [#allocation4], 1 }
 0x32d   :  { %623 = vsyncpa [#allocation4 + $0x1], 1 }
 0x32e   :  { %624 = vsyncpa [#allocation7], 1 }
 0x32f   :  { %625 = vsyncpa [#allocation5], 1 }
 0x330   :  { %627 = vsyncpa [#allocation5 + $0x1], 1 }

</bundles_post_ra>
